<compile_context>
chip_gen: v6e
topology: v6e:2x2x1
jax: 0.10.0
libtpu: 0.0.40
codegen_flags: <defaults>
</compile_context>

<pallas_src>
import jax
import jax.numpy as jnp
import numpy as np
from jax.experimental import pallas as pl
from jax.experimental.pallas import tpu as pltpu


# ---------------------------------------------------------------------------
# In-kernel math helpers (all elementwise math stays f32)
# ---------------------------------------------------------------------------
def _softplus(x):
    # Numerically stable softplus: max(x, 0) + log1p(exp(-|x|))
    return jnp.maximum(x, 0.0) + jnp.log1p(jnp.exp(-jnp.abs(x)))


def _swish(x):
    # Exact sigmoid.  If a profile shows the divide's VPU refinement as the
    # binding slot, swap for x * pl.reciprocal(1.0 + jnp.exp(-x), approx=True).
    return x * (1.0 / (1.0 + jnp.exp(-x)))


def _clamp_and_select(h, bounds):
    """Single-pass soft clamp over the whole output slab.

    bounds rows: 0 = max_logvar, 1 = min_logvar, 2 = {0,1} mask selecting which
    columns are logvars (mean / padding columns pass through untouched).
    """
    max_lv = bounds[0:1, :]
    min_lv = bounds[1:2, :]
    lv_mask = bounds[2:3, :]
    clamped = max_lv - _softplus(max_lv - h)
    clamped = min_lv + _softplus(clamped - min_lv)
    return jnp.where(lv_mask > 0.5, clamped, h)


# ---------------------------------------------------------------------------
# Kernel factories
# ---------------------------------------------------------------------------
def _make_packed_kernel(n_layers):
    """One grid step == one batch tile through the lane-packed ensemble."""
    def kernel(*refs):
        # refs: s, a, w0_s, w0_a, b0, (w, b) * (n_layers - 1), bounds, out
        s = refs[0][...]
        a = refs[1][...]
        w0_s = refs[2][...]
        w0_a = refs[3][...]
        b0 = refs[4][...]
        # fused torch.cat: states @ w0_s + actions @ w0_a == cat(s, a) @ w0
        h = (jnp.dot(s.astype(w0_s.dtype), w0_s, preferred_element_type=jnp.float32)
             + jnp.dot(a.astype(w0_a.dtype), w0_a, preferred_element_type=jnp.float32)
             + b0)
        if n_layers > 1:
            h = _swish(h)
        idx = 5
        for layer in range(1, n_layers):
            w = refs[idx][...]
            b = refs[idx + 1][...]
            idx += 2
            h = jnp.dot(h.astype(w.dtype), w, preferred_element_type=jnp.float32) + b
            if layer < n_layers - 1:
                h = _swish(h)
        bounds = refs[idx][...]
        out_ref = refs[idx + 1]
        out_ref[...] = _clamp_and_select(h, bounds)
    return kernel


def _make_member_kernel(n_layers, per_member_inputs):
    """One grid step == one (member, batch tile) pair with per-member weights."""
    def kernel(*refs):
        if per_member_inputs:
            s = refs[0][0]
            a = refs[1][0]
        else:
            s = refs[0][...]
            a = refs[1][...]
        w0_s = refs[2][0]
        w0_a = refs[3][0]
        b0 = refs[4][0]
        h = (jnp.dot(s.astype(w0_s.dtype), w0_s, preferred_element_type=jnp.float32)
             + jnp.dot(a.astype(w0_a.dtype), w0_a, preferred_element_type=jnp.float32)
             + b0)
        if n_layers > 1:
            h = _swish(h)
        idx = 5
        for layer in range(1, n_layers):
            w = refs[idx][0]
            b = refs[idx + 1][0]
            idx += 2
            h = jnp.dot(h.astype(w.dtype), w, preferred_element_type=jnp.float32) + b
            if layer < n_layers - 1:
                h = _swish(h)
        bounds = refs[idx][...]
        out_ref = refs[idx + 1]
        out_ref[0] = _clamp_and_select(h, bounds)
    return kernel


# ---------------------------------------------------------------------------
# Wrapper-side packing helpers
# ---------------------------------------------------------------------------
def _block_diag(ws):
    """(E, d_in, d_out) per-member weights -> (E*d_in, E*d_out) block-diagonal."""
    E, din, dout = ws.shape
    out = jnp.zeros((E * din, E * dout), ws.dtype)
    for e in range(E):
        out = jax.lax.dynamic_update_slice(out, ws[e], (e * din, e * dout))
    return out


def _round_up(x, m):
    return ((x + m - 1) // m) * m


def _choose_batch_tile(B, cap=256):
    """Batch tile: multiple of 8 sublanes, capped at `cap` rows (keeps the
    double-buffered VMEM window tiny and the pipeline running), and >= 2 tiles
    whenever B >= 16 so the 'parallel' batch axis can shard across v7x's two
    TensorCores."""
    if B >= 16:
        tb = min(cap, (B + 1) // 2)
        tb = max(8, (tb // 8) * 8)
    else:
        tb = 8
    return tb, _round_up(B, tb)


def _default_mxu_dtype():
    """bf16 MXU operands on v6e/v7x (native MXU dtype, halves weight DMA/VMEM);
    f32 elsewhere.  Elementwise math stays f32 in every path."""
    try:
        kind = jax.devices()[0].device_kind.lower()
    except Exception:
        return jnp.float32
    if "v6" in kind or "v7" in kind:
        return jnp.bfloat16
    return jnp.float32


def _logvar_bounds_rows(params, state_dim, reward_dim):
    S, R = state_dim, reward_dim
    zs = jnp.zeros((1, S), jnp.float32)
    zr = jnp.zeros((1, R), jnp.float32)
    max_row = jnp.concatenate(
        [zs, params["max_state_logvar"].astype(jnp.float32),
         zr, params["max_reward_logvar"].astype(jnp.float32)], axis=-1)
    min_row = jnp.concatenate(
        [zs, params["min_state_logvar"].astype(jnp.float32),
         zr, params["min_reward_logvar"].astype(jnp.float32)], axis=-1)
    mask_row = jnp.concatenate(
        [zs, jnp.ones((1, S), jnp.float32), zr, jnp.ones((1, R), jnp.float32)],
        axis=-1)
    return max_row, min_row, mask_row            # each (1, D_out)


def _split_outputs(y, S, R):
    return {
        "diff_state_means": y[..., :S],
        "diff_state_logvars": y[..., S:2 * S],
        "reward_means": y[..., 2 * S:2 * S + R],
        "reward_logvars": y[..., 2 * S + R:2 * S + 2 * R],
    }


# ---------------------------------------------------------------------------
# Packed fast path (shared 2-D inputs, small E*width)
# ---------------------------------------------------------------------------
def _forward_packed(states, actions, weights, biases, max_row, min_row, mask_row,
                    *, E, n_layers, S, R, D_out, S_in, A_in, mxu_dtype, unpack):
    B = states.shape[0]
    H0 = weights[0].shape[2]

    # layer 0: concat member weights along the out dim, split rows into the
    # state / action halves (fuses the torch.cat into two dots in-kernel).
    w0 = jnp.transpose(weights[0], (1, 0, 2)).reshape(S_in + A_in, E * H0)
    w0_s = w0[:S_in, :]
    w0_a = w0[S_in:, :]
    b0 = biases[0].reshape(1, E * H0).astype(jnp.float32)

    packed_w = [None]
    packed_b = [None]
    for li in range(1, n_layers):
        packed_w.append(_block_diag(weights[li]))
        packed_b.append(
            biases[li].reshape(1, E * weights[li].shape[2]).astype(jnp.float32))

    # lane-dense output slab (unmasked vst): pad E*D_out up to a 128 multiple
    W_raw = E * D_out
    W_pad = _round_up(W_raw, 128)
    pad = W_pad - W_raw
    if n_layers > 1:
        if pad:
            packed_w[-1] = jnp.pad(packed_w[-1], ((0, 0), (0, pad)))
            packed_b[-1] = jnp.pad(packed_b[-1], ((0, 0), (0, pad)))
    else:
        if pad:
            w0_s = jnp.pad(w0_s, ((0, 0), (0, pad)))
            w0_a = jnp.pad(w0_a, ((0, 0), (0, pad)))
            b0 = jnp.pad(b0, ((0, 0), (0, pad)))

    # bf16 only at the MXU inputs (accumulation + elementwise stay f32)
    w0_s = w0_s.astype(mxu_dtype)
    w0_a = w0_a.astype(mxu_dtype)
    packed_w = [None] + [w.astype(mxu_dtype) for w in packed_w[1:]]

    # single combined grid-invariant bounds input: rows 0=max, 1=min, 2=mask
    rows = jnp.concatenate([jnp.tile(max_row, (1, E)),
                            jnp.tile(min_row, (1, E)),
                            jnp.tile(mask_row, (1, E))], axis=0)
    bounds = jnp.pad(rows, ((0, 5), (0, pad)))                 # (8, W_pad)

    # batch tiling: capped tile, >= 2 tiles when possible, padded batch
    TB, B_pad = _choose_batch_tile(B)
    n_tiles = B_pad // TB
    if B_pad != B:
        states = jnp.pad(states, ((0, B_pad - B), (0, 0)))
        actions = jnp.pad(actions, ((0, B_pad - B), (0, 0)))

    kernel = _make_packed_kernel(n_layers)

    def batch_spec(shape):
        return pl.BlockSpec(shape, lambda i: (i, 0))

    def invariant(shape):
        # grid-invariant operand: always block (0, 0) -> DMA'd once, VMEM-resident
        return pl.BlockSpec(shape, lambda i: (0, 0))

    in_specs = [batch_spec((TB, S_in)), batch_spec((TB, A_in)),
                invariant(w0_s.shape), invariant(w0_a.shape), invariant(b0.shape)]
    inputs = [states, actions, w0_s, w0_a, b0]
    for li in range(1, n_layers):
        in_specs += [invariant(packed_w[li].shape), invariant(packed_b[li].shape)]
        inputs += [packed_w[li], packed_b[li]]
    in_specs.append(invariant(bounds.shape))
    inputs.append(bounds)

    out = pl.pallas_call(
        kernel,
        grid=(n_tiles,),
        in_specs=in_specs,
        out_specs=pl.BlockSpec((TB, W_pad), lambda i: (i, 0)),
        out_shape=jax.ShapeDtypeStruct((B_pad, W_pad), jnp.float32),
        compiler_params=pltpu.CompilerParams(
            dimension_semantics=("parallel",)),
    )(*inputs)

    if not unpack:
        # Lane-dense slab: rows [0, B), columns per member laid out as
        # [mean_S | logvar_S | mean_R | logvar_R] * E, zero-padded to W_pad.
        # Downstream consumers should read this directly to skip the extra
        # HBM pass of the slice + transpose below.
        return {"packed_output": out, "batch": B, "num_networks": E,
                "member_width": D_out}

    y = out[:B, :W_raw].reshape(B, E, D_out)
    y = jnp.transpose(y, (1, 0, 2))            # (E, B, D_out)
    return _split_outputs(y, S, R)


# ---------------------------------------------------------------------------
# Per-member fallback path (3-D inputs, or E*width too wide for block-diag)
# ---------------------------------------------------------------------------
def _forward_per_member(states, actions, weights, biases, max_row, min_row, mask_row,
                        *, E, n_layers, S, R, D_out, S_in, A_in, mxu_dtype,
                        per_member_inputs):
    B = states.shape[1] if per_member_inputs else states.shape[0]
    D_out_pad = _round_up(D_out, 128)
    pad = D_out_pad - D_out

    w0_s = weights[0][:, :S_in, :]
    w0_a = weights[0][:, S_in:, :]
    b0 = biases[0].astype(jnp.float32)
    layer_w = [None] + [weights[li] for li in range(1, n_layers)]
    layer_b = [None] + [biases[li].astype(jnp.float32) for li in range(1, n_layers)]
    if n_layers > 1:
        if pad:
            layer_w[-1] = jnp.pad(layer_w[-1], ((0, 0), (0, 0), (0, pad)))
            layer_b[-1] = jnp.pad(layer_b[-1], ((0, 0), (0, 0), (0, pad)))
    else:
        if pad:
            w0_s = jnp.pad(w0_s, ((0, 0), (0, 0), (0, pad)))
            w0_a = jnp.pad(w0_a, ((0, 0), (0, 0), (0, pad)))
            b0 = jnp.pad(b0, ((0, 0), (0, 0), (0, pad)))

    w0_s = w0_s.astype(mxu_dtype)
    w0_a = w0_a.astype(mxu_dtype)
    layer_w = [None] + [w.astype(mxu_dtype) for w in layer_w[1:]]

    rows = jnp.concatenate([max_row, min_row, mask_row], axis=0)   # (3, D_out)
    bounds = jnp.pad(rows, ((0, 5), (0, pad)))                     # (8, D_out_pad)

    TB, B_pad = _choose_batch_tile(B)
    n_tiles = B_pad // TB
    if B_pad != B:
        if per_member_inputs:
            states = jnp.pad(states, ((0, 0), (0, B_pad - B), (0, 0)))
            actions = jnp.pad(actions, ((0, 0), (0, B_pad - B), (0, 0)))
        else:
            states = jnp.pad(states, ((0, B_pad - B), (0, 0)))
            actions = jnp.pad(actions, ((0, B_pad - B), (0, 0)))

    kernel = _make_member_kernel(n_layers, per_member_inputs)

    def member3(shape):
        return pl.BlockSpec((1,) + tuple(shape[1:]), lambda e, i: (e, 0, 0))

    if per_member_inputs:
        s_spec = pl.BlockSpec((1, TB, S_in), lambda e, i: (e, i, 0))
        a_spec = pl.BlockSpec((1, TB, A_in), lambda e, i: (e, i, 0))
    else:
        s_spec = pl.BlockSpec((TB, S_in), lambda e, i: (i, 0))
        a_spec = pl.BlockSpec((TB, A_in), lambda e, i: (i, 0))

    in_specs = [s_spec, a_spec, member3(w0_s.shape), member3(w0_a.shape),
                member3(b0.shape)]
    inputs = [states, actions, w0_s, w0_a, b0]
    for li in range(1, n_layers):
        in_specs += [member3(layer_w[li].shape), member3(layer_b[li].shape)]
        inputs += [layer_w[li], layer_b[li]]
    in_specs.append(pl.BlockSpec((8, D_out_pad), lambda e, i: (0, 0)))
    inputs.append(bounds)

    out = pl.pallas_call(
        kernel,
        # batch axis innermost: a member's weights stay VMEM-resident across
        # the whole batch and are DMA'd only once per member.
        grid=(E, n_tiles),
        in_specs=in_specs,
        out_specs=pl.BlockSpec((1, TB, D_out_pad), lambda e, i: (e, i, 0)),
        out_shape=jax.ShapeDtypeStruct((E, B_pad, D_out_pad), jnp.float32),
        compiler_params=pltpu.CompilerParams(
            dimension_semantics=("parallel", "parallel")),
    )(*inputs)

    y = out[:, :B, :D_out]
    return _split_outputs(y, S, R)


# ---------------------------------------------------------------------------
# Public forward (use_factored=True path of EnsembleRDynamics.forward)
# ---------------------------------------------------------------------------
def ensemble_rdynamics_forward(states, actions, params, *, state_dim, reward_dim,
                               mxu_dtype=None, unpack=True, force_per_member=False):
    """states/actions: shared (B, S)/(B, A), or per-member (E, B, S)/(E, B, A)."""
    weights = params["weights"]          # list of (E, d_in, d_out)
    biases = params["biases"]            # list of (E, 1, d_out)
    assert states.ndim == actions.ndim and states.ndim in (2, 3)

    E = weights[0].shape[0]
    n_layers = len(weights)
    S, R = state_dim, reward_dim
    D_out = 2 * S + 2 * R
    S_in = states.shape[-1]
    A_in = actions.shape[-1]
    per_member_inputs = states.ndim == 3
    if per_member_inputs:
        assert states.shape[0] == E and actions.shape[0] == E

    if mxu_dtype is None:
        mxu_dtype = _default_mxu_dtype()

    max_row, min_row, mask_row = _logvar_bounds_rows(params, S, R)

    # Packed block-diagonal lanes only pay off while E*width fits in a couple
    # of MXU tiles; beyond that the zero blocks waste (E-1)/E of FLOPs + VMEM,
    # so switch hidden layers to a per-member grid axis instead.
    hidden_widths = [w.shape[2] for w in weights[:-1]]
    packed_widths = [E * h for h in hidden_widths] + [E * D_out]
    use_packed = ((not per_member_inputs) and (not force_per_member)
                  and max(packed_widths) <= 256)

    if use_packed:
        return _forward_packed(states, actions, weights, biases,
                               max_row, min_row, mask_row,
                               E=E, n_layers=n_layers, S=S, R=R, D_out=D_out,
                               S_in=S_in, A_in=A_in, mxu_dtype=mxu_dtype,
                               unpack=unpack)
    return _forward_per_member(states, actions, weights, biases,
                               max_row, min_row, mask_row,
                               E=E, n_layers=n_layers, S=S, R=R, D_out=D_out,
                               S_in=S_in, A_in=A_in, mxu_dtype=mxu_dtype,
                               per_member_inputs=per_member_inputs)


# ---------------------------------------------------------------------------
# Deterministic parameter construction (truncated-normal weights, zero biases)
# ---------------------------------------------------------------------------
def init_params(key, state_dim, action_dim, reward_dim, hidden_dims, num_networks):
    d_in = state_dim + action_dim
    d_out = 2 * state_dim + 2 * reward_dim
    layer_dims = [d_in] + list(hidden_dims) + [d_out]

    weights, biases = [], []
    for li in range(len(layer_dims) - 1):
        di, do = layer_dims[li], layer_dims[li + 1]
        key, sub = jax.random.split(key)
        std = 1.0 / (2.0 * np.sqrt(di))
        w = std * jax.random.truncated_normal(
            sub, -2.0, 2.0, (num_networks, di, do), dtype=jnp.float32)
        b = jnp.zeros((num_networks, 1, do), dtype=jnp.float32)
        weights.append(w)
        biases.append(b)

    return {
        "weights": weights,
        "biases": biases,
        "max_state_logvar": jnp.ones((1, state_dim), jnp.float32) / 2.0,
        "min_state_logvar": -jnp.ones((1, state_dim), jnp.float32) * 10.0,
        "max_reward_logvar": jnp.ones((1, reward_dim), jnp.float32) / 2.0,
        "min_reward_logvar": -jnp.ones((1, reward_dim), jnp.float32) * 10.0,
    }


# ---------------------------------------------------------------------------
# Pure-JAX reference (mirrors the PyTorch forward) for correctness checks
# ---------------------------------------------------------------------------
def reference_forward(states, actions, params, *, state_dim, reward_dim):
    x = jnp.concatenate([states, actions], axis=-1)
    E = params["weights"][0].shape[0]
    if x.ndim == 2:
        x = jnp.broadcast_to(x[None], (E,) + x.shape)
    n_layers = len(params["weights"])
    h = x
    for li, (w, b) in enumerate(zip(params["weights"], params["biases"])):
        h = jnp.einsum("ebi,eio->ebo", h, w) + b
        if li < n_layers - 1:
            h = h * jax.nn.sigmoid(h)
    S, R = state_dim, reward_dim
    ds_mean, ds_logvar = h[..., :S], h[..., S:2 * S]
    r_mean, r_logvar = h[..., 2 * S:2 * S + R], h[..., 2 * S + R:2 * S + 2 * R]
    max_s, min_s = params["max_state_logvar"], params["min_state_logvar"]
    max_r, min_r = params["max_reward_logvar"], params["min_reward_logvar"]
    ds_logvar = max_s - jax.nn.softplus(max_s - ds_logvar)
    ds_logvar = min_s + jax.nn.softplus(ds_logvar - min_s)
    r_logvar = max_r - jax.nn.softplus(max_r - r_logvar)
    r_logvar = min_r + jax.nn.softplus(r_logvar - min_r)
    return {
        "diff_state_means": ds_mean,
        "diff_state_logvars": ds_logvar,
        "reward_means": r_mean,
        "reward_logvars": r_logvar,
    }


if __name__ == "__main__":
    STATE_DIM, ACTION_DIM, REWARD_DIM = 8, 4, 1
    HIDDEN_DIMS = [32, 32]
    NUM_NETWORKS = 4
    BATCH = 16

    key = jax.random.PRNGKey(0)
    kp, ks, ka, ks3, ka3 = jax.random.split(key, 5)

    params = init_params(kp, STATE_DIM, ACTION_DIM, REWARD_DIM, HIDDEN_DIMS,
                         NUM_NETWORKS)
    states = jax.random.normal(ks, (BATCH, STATE_DIM), dtype=jnp.float32)
    actions = jax.random.normal(ka, (BATCH, ACTION_DIM), dtype=jnp.float32)
    states3 = jax.random.normal(ks3, (NUM_NETWORKS, BATCH, STATE_DIM),
                                dtype=jnp.float32)
    actions3 = jax.random.normal(ka3, (NUM_NETWORKS, BATCH, ACTION_DIM),
                                 dtype=jnp.float32)

    KEYS = ("diff_state_means", "diff_state_logvars",
            "reward_means", "reward_logvars")

    # 1) packed fast path (E*H == 128 lanes), f32 MXU operands: strict check
    out = ensemble_rdynamics_forward(states, actions, params, state_dim=STATE_DIM,
                                     reward_dim=REWARD_DIM, mxu_dtype=jnp.float32)
    jax.block_until_ready(out)
    ref = reference_forward(states, actions, params, state_dim=STATE_DIM,
                            reward_dim=REWARD_DIM)
    for k in KEYS:
        np.testing.assert_allclose(np.asarray(out[k]), np.asarray(ref[k]),
                                   rtol=1e-4, atol=1e-5)

    # 2) packed path with the chip-default MXU dtype (bf16 on v6e/v7x): loose check
    out_fast = ensemble_rdynamics_forward(states, actions, params,
                                          state_dim=STATE_DIM,
                                          reward_dim=REWARD_DIM)
    jax.block_until_ready(out_fast)
    for k in KEYS:
        np.testing.assert_allclose(np.asarray(out_fast[k]), np.asarray(ref[k]),
                                   rtol=5e-2, atol=5e-2)

    # 3) per-member (E, B, .) inputs -> per-member grid path: strict check
    out3 = ensemble_rdynamics_forward(states3, actions3, params,
                                      state_dim=STATE_DIM, reward_dim=REWARD_DIM,
                                      mxu_dtype=jnp.float32)
    jax.block_until_ready(out3)
    ref3 = reference_forward(states3, actions3, params, state_dim=STATE_DIM,
                             reward_dim=REWARD_DIM)
    for k in KEYS:
        np.testing.assert_allclose(np.asarray(out3[k]), np.asarray(ref3[k]),
                                   rtol=1e-4, atol=1e-5)

    # 4) guard/fallback route with shared inputs (what large E*H configs take)
    out4 = ensemble_rdynamics_forward(states, actions, params,
                                      state_dim=STATE_DIM, reward_dim=REWARD_DIM,
                                      mxu_dtype=jnp.float32,
                                      force_per_member=True)
    jax.block_until_ready(out4)
    for k in KEYS:
        np.testing.assert_allclose(np.asarray(out4[k]), np.asarray(ref[k]),
                                   rtol=1e-4, atol=1e-5)

    # TODO(synk): predict()'s elite-index gather + Normal sampling and the
    # training-side snapshot / backward-hook bookkeeping are host-side logic,
    # not kernel work; state/action normalizers are Identity here.
    print("KERNEL_OK")
</pallas_src>

<mosaic_0001>
module attributes {stable_mosaic.version = 11 : i64} {
  func.func @kernel(%arg0: i32, %arg1: memref<8x8xf32, #tpu.memory_space<vmem>>, %arg2: memref<8x4xf32, #tpu.memory_space<vmem>>, %arg3: memref<8x128xf32, #tpu.memory_space<vmem>>, %arg4: memref<4x128xf32, #tpu.memory_space<vmem>>, %arg5: memref<1x128xf32, #tpu.memory_space<vmem>>, %arg6: memref<128x128xf32, #tpu.memory_space<vmem>>, %arg7: memref<1x128xf32, #tpu.memory_space<vmem>>, %arg8: memref<128x128xf32, #tpu.memory_space<vmem>>, %arg9: memref<1x128xf32, #tpu.memory_space<vmem>>, %arg10: memref<8x128xf32, #tpu.memory_space<vmem>>, %arg11: memref<8x128xf32, #tpu.memory_space<vmem>>) attributes {dimension_semantics = [#tpu.dimension_semantics<parallel>], iteration_bounds = array<i64: 2>, scalar_prefetch = 0 : i64, scratch_operands = 0 : i64, tpu.core_type = #tpu.core_type<tc>, window_params = [{transform_indices = @transform_0, window_bounds = array<i64: 8, 8>}, {transform_indices = @transform_1, window_bounds = array<i64: 8, 4>}, {pipeline_mode = #tpu.pipeline_mode<synchronous>, transform_indices = @transform_2, window_bounds = array<i64: 8, 128>}, {pipeline_mode = #tpu.pipeline_mode<synchronous>, transform_indices = @transform_3, window_bounds = array<i64: 4, 128>}, {pipeline_mode = #tpu.pipeline_mode<synchronous>, transform_indices = @transform_4, window_bounds = array<i64: 1, 128>}, {pipeline_mode = #tpu.pipeline_mode<synchronous>, transform_indices = @transform_5, window_bounds = array<i64: 128, 128>}, {pipeline_mode = #tpu.pipeline_mode<synchronous>, transform_indices = @transform_6, window_bounds = array<i64: 1, 128>}, {pipeline_mode = #tpu.pipeline_mode<synchronous>, transform_indices = @transform_7, window_bounds = array<i64: 128, 128>}, {pipeline_mode = #tpu.pipeline_mode<synchronous>, transform_indices = @transform_8, window_bounds = array<i64: 1, 128>}, {pipeline_mode = #tpu.pipeline_mode<synchronous>, transform_indices = @transform_9, window_bounds = array<i64: 8, 128>}, {transform_indices = @transform_10, window_bounds = array<i64: 8, 128>}]} {
    %c0 = arith.constant 0 : index
    %c0_0 = arith.constant 0 : index
    %0 = vector.load %arg1[%c0, %c0_0] : memref<8x8xf32, #tpu.memory_space<vmem>>, vector<8x8xf32>
    %c0_1 = arith.constant 0 : index
    %c0_2 = arith.constant 0 : index
    %1 = vector.load %arg2[%c0_1, %c0_2] : memref<8x4xf32, #tpu.memory_space<vmem>>, vector<8x4xf32>
    %c0_3 = arith.constant 0 : index
    %c0_4 = arith.constant 0 : index
    %2 = vector.load %arg3[%c0_3, %c0_4] : memref<8x128xf32, #tpu.memory_space<vmem>>, vector<8x128xf32>
    %c0_5 = arith.constant 0 : index
    %c0_6 = arith.constant 0 : index
    %3 = vector.load %arg4[%c0_5, %c0_6] : memref<4x128xf32, #tpu.memory_space<vmem>>, vector<4x128xf32>
    %c0_7 = arith.constant 0 : index
    %c0_8 = arith.constant 0 : index
    %4 = vector.load %arg5[%c0_7, %c0_8] : memref<1x128xf32, #tpu.memory_space<vmem>>, vector<1x128xf32>
    %cst = arith.constant dense<0.000000e+00> : vector<8x128xf32>
    %5 = tpu.matmul %0, %2, %cst {dimension_numbers = #tpu.dot_dimension_numbers<[1], [0], [0], [1], [0, 0, 1, 1], [], []>} : vector<8x8xf32>, vector<8x128xf32>, vector<8x128xf32> -> vector<8x128xf32>
    %cst_9 = arith.constant dense<0.000000e+00> : vector<8x128xf32>
    %6 = tpu.matmul %1, %3, %cst_9 {dimension_numbers = #tpu.dot_dimension_numbers<[1], [0], [0], [1], [0, 0, 1, 1], [], []>} : vector<8x4xf32>, vector<4x128xf32>, vector<8x128xf32> -> vector<8x128xf32>
    %7 = arith.addf %5, %6 : vector<8x128xf32>
    %8 = vector.broadcast %4 : vector<1x128xf32> to vector<8x128xf32>
    %9 = arith.addf %7, %8 : vector<8x128xf32>
    %cst_10 = arith.constant 0.000000e+00 : f32
    %10 = vector.broadcast %cst_10 : f32 to vector<8x128xf32>
    %11 = arith.subf %10, %9 : vector<8x128xf32>
    %12 = math.exp %11 : vector<8x128xf32>
    %cst_11 = arith.constant 1.000000e+00 : f32
    %13 = vector.broadcast %cst_11 : f32 to vector<8x128xf32>
    %14 = arith.addf %13, %12 : vector<8x128xf32>
    %cst_12 = arith.constant 1.000000e+00 : f32
    %15 = vector.broadcast %cst_12 : f32 to vector<8x128xf32>
    %16 = arith.divf %15, %14 : vector<8x128xf32>
    %17 = arith.mulf %9, %16 : vector<8x128xf32>
    %c0_13 = arith.constant 0 : index
    %c0_14 = arith.constant 0 : index
    %18 = vector.load %arg6[%c0_13, %c0_14] : memref<128x128xf32, #tpu.memory_space<vmem>>, vector<128x128xf32>
    %c0_15 = arith.constant 0 : index
    %c0_16 = arith.constant 0 : index
    %19 = vector.load %arg7[%c0_15, %c0_16] : memref<1x128xf32, #tpu.memory_space<vmem>>, vector<1x128xf32>
    %cst_17 = arith.constant dense<0.000000e+00> : vector<8x128xf32>
    %20 = tpu.matmul %17, %18, %cst_17 {dimension_numbers = #tpu.dot_dimension_numbers<[1], [0], [0], [1], [0, 0, 1, 1], [], []>} : vector<8x128xf32>, vector<128x128xf32>, vector<8x128xf32> -> vector<8x128xf32>
    %21 = vector.broadcast %19 : vector<1x128xf32> to vector<8x128xf32>
    %22 = arith.addf %20, %21 : vector<8x128xf32>
    %cst_18 = arith.constant 0.000000e+00 : f32
    %23 = vector.broadcast %cst_18 : f32 to vector<8x128xf32>
    %24 = arith.subf %23, %22 : vector<8x128xf32>
    %25 = math.exp %24 : vector<8x128xf32>
    %cst_19 = arith.constant 1.000000e+00 : f32
    %26 = vector.broadcast %cst_19 : f32 to vector<8x128xf32>
    %27 = arith.addf %26, %25 : vector<8x128xf32>
    %cst_20 = arith.constant 1.000000e+00 : f32
    %28 = vector.broadcast %cst_20 : f32 to vector<8x128xf32>
    %29 = arith.divf %28, %27 : vector<8x128xf32>
    %30 = arith.mulf %22, %29 : vector<8x128xf32>
    %c0_21 = arith.constant 0 : index
    %c0_22 = arith.constant 0 : index
    %31 = vector.load %arg8[%c0_21, %c0_22] : memref<128x128xf32, #tpu.memory_space<vmem>>, vector<128x128xf32>
    %c0_23 = arith.constant 0 : index
    %c0_24 = arith.constant 0 : index
    %32 = vector.load %arg9[%c0_23, %c0_24] : memref<1x128xf32, #tpu.memory_space<vmem>>, vector<1x128xf32>
    %cst_25 = arith.constant dense<0.000000e+00> : vector<8x128xf32>
    %33 = tpu.matmul %30, %31, %cst_25 {dimension_numbers = #tpu.dot_dimension_numbers<[1], [0], [0], [1], [0, 0, 1, 1], [], []>} : vector<8x128xf32>, vector<128x128xf32>, vector<8x128xf32> -> vector<8x128xf32>
    %34 = vector.broadcast %32 : vector<1x128xf32> to vector<8x128xf32>
    %35 = arith.addf %33, %34 : vector<8x128xf32>
    %c0_26 = arith.constant 0 : index
    %c0_27 = arith.constant 0 : index
    %36 = vector.load %arg10[%c0_26, %c0_27] : memref<8x128xf32, #tpu.memory_space<vmem>>, vector<8x128xf32>
    %37 = vector.extract_strided_slice %36 {offsets = [0, 0], sizes = [1, 128], strides = [1, 1]} : vector<8x128xf32> to vector<1x128xf32>
    %38 = vector.extract_strided_slice %36 {offsets = [1, 0], sizes = [1, 128], strides = [1, 1]} : vector<8x128xf32> to vector<1x128xf32>
    %39 = vector.extract_strided_slice %36 {offsets = [2, 0], sizes = [1, 128], strides = [1, 1]} : vector<8x128xf32> to vector<1x128xf32>
    %40 = vector.broadcast %37 : vector<1x128xf32> to vector<8x128xf32>
    %41 = arith.subf %40, %35 : vector<8x128xf32>
    %cst_28 = arith.constant 0.000000e+00 : f32
    %42 = vector.broadcast %cst_28 : f32 to vector<8x128xf32>
    %43 = arith.maximumf %41, %42 : vector<8x128xf32>
    %44 = math.absf %41 : vector<8x128xf32>
    %cst_29 = arith.constant 0.000000e+00 : f32
    %45 = vector.broadcast %cst_29 : f32 to vector<8x128xf32>
    %46 = arith.subf %45, %44 : vector<8x128xf32>
    %47 = math.exp %46 : vector<8x128xf32>
    %48 = math.log1p %47 : vector<8x128xf32>
    %49 = arith.addf %43, %48 : vector<8x128xf32>
    %50 = vector.broadcast %37 : vector<1x128xf32> to vector<8x128xf32>
    %51 = arith.subf %50, %49 : vector<8x128xf32>
    %52 = vector.broadcast %38 : vector<1x128xf32> to vector<8x128xf32>
    %53 = arith.subf %51, %52 : vector<8x128xf32>
    %cst_30 = arith.constant 0.000000e+00 : f32
    %54 = vector.broadcast %cst_30 : f32 to vector<8x128xf32>
    %55 = arith.maximumf %53, %54 : vector<8x128xf32>
    %56 = math.absf %53 : vector<8x128xf32>
    %cst_31 = arith.constant 0.000000e+00 : f32
    %57 = vector.broadcast %cst_31 : f32 to vector<8x128xf32>
    %58 = arith.subf %57, %56 : vector<8x128xf32>
    %59 = math.exp %58 : vector<8x128xf32>
    %60 = math.log1p %59 : vector<8x128xf32>
    %61 = arith.addf %55, %60 : vector<8x128xf32>
    %62 = vector.broadcast %38 : vector<1x128xf32> to vector<8x128xf32>
    %63 = arith.addf %62, %61 : vector<8x128xf32>
    %cst_32 = arith.constant 5.000000e-01 : f32
    %64 = vector.broadcast %cst_32 : f32 to vector<1x128xf32>
    %65 = arith.cmpf ogt, %39, %64 : vector<1x128xf32>
    %66 = vector.shape_cast %65 : vector<1x128xi1> to vector<1x128xi1>
    %67 = vector.broadcast %66 : vector<1x128xi1> to vector<8x128xi1>
    %68 = arith.select %67, %63, %35 : vector<8x128xi1>, vector<8x128xf32>
    %c0_33 = arith.constant 0 : index
    %c0_34 = arith.constant 0 : index
    %69 = vector.load %arg11[%c0_33, %c0_34] : memref<8x128xf32, #tpu.memory_space<vmem>>, vector<8x128xf32>
    tpu.vector_store %arg11[%c0_33, %c0_34], %68 {strides = array<i32>} : memref<8x128xf32, #tpu.memory_space<vmem>>, vector<8x128xf32>,
    return
  }
  func.func @transform_0(%arg0: i32) -> (i32, i32) {
    %c0_i32 = arith.constant 0 : i32
    %c0_i32_0 = arith.constant 0 : i32
    return %arg0, %c0_i32 : i32, i32
  }
  func.func @transform_1(%arg0: i32) -> (i32, i32) {
    %c0_i32 = arith.constant 0 : i32
    %c0_i32_0 = arith.constant 0 : i32
    return %arg0, %c0_i32 : i32, i32
  }
  func.func @transform_2(%arg0: i32) -> (i32, i32) {
    %c0_i32 = arith.constant 0 : i32
    %c0_i32_0 = arith.constant 0 : i32
    %c0_i32_1 = arith.constant 0 : i32
    return %c0_i32, %c0_i32_0 : i32, i32
  }
  func.func @transform_3(%arg0: i32) -> (i32, i32) {
    %c0_i32 = arith.constant 0 : i32
    %c0_i32_0 = arith.constant 0 : i32
    %c0_i32_1 = arith.constant 0 : i32
    return %c0_i32, %c0_i32_0 : i32, i32
  }
  func.func @transform_4(%arg0: i32) -> (i32, i32) {
    %c0_i32 = arith.constant 0 : i32
    %c0_i32_0 = arith.constant 0 : i32
    %c0_i32_1 = arith.constant 0 : i32
    return %c0_i32, %c0_i32_0 : i32, i32
  }
  func.func @transform_5(%arg0: i32) -> (i32, i32) {
    %c0_i32 = arith.constant 0 : i32
    %c0_i32_0 = arith.constant 0 : i32
    %c0_i32_1 = arith.constant 0 : i32
    return %c0_i32, %c0_i32_0 : i32, i32
  }
  func.func @transform_6(%arg0: i32) -> (i32, i32) {
    %c0_i32 = arith.constant 0 : i32
    %c0_i32_0 = arith.constant 0 : i32
    %c0_i32_1 = arith.constant 0 : i32
    return %c0_i32, %c0_i32_0 : i32, i32
  }
  func.func @transform_7(%arg0: i32) -> (i32, i32) {
    %c0_i32 = arith.constant 0 : i32
    %c0_i32_0 = arith.constant 0 : i32
    %c0_i32_1 = arith.constant 0 : i32
    return %c0_i32, %c0_i32_0 : i32, i32
  }
  func.func @transform_8(%arg0: i32) -> (i32, i32) {
    %c0_i32 = arith.constant 0 : i32
    %c0_i32_0 = arith.constant 0 : i32
    %c0_i32_1 = arith.constant 0 : i32
    return %c0_i32, %c0_i32_0 : i32, i32
  }
  func.func @transform_9(%arg0: i32) -> (i32, i32) {
    %c0_i32 = arith.constant 0 : i32
    %c0_i32_0 = arith.constant 0 : i32
    %c0_i32_1 = arith.constant 0 : i32
    return %c0_i32, %c0_i32_0 : i32, i32
  }
  func.func @transform_10(%arg0: i32) -> (i32, i32) {
    %c0_i32 = arith.constant 0 : i32
    %c0_i32_0 = arith.constant 0 : i32
    return %arg0, %c0_i32 : i32, i32
  }
}

</mosaic_0001>

<bundles_post_ra>
// kernel: tpu_custom_call.1
= control target key start
LH: loop header
LB: loop body
LE: loop exit
PB: predicated region body
PF: predicated region fallthrough
CT: control target
= control target key end

     0   :  { %s1527_s0 = inlined_call_operand.vmem [shape: f32[16,8], index: 0, kind: input, shape index: {}]   ;;  %s1528_s1 = inlined_call_operand.vmem [shape: f32[16,4], index: 1, kind: input, shape index: {}]   ;;  %s1529_s2 = inlined_call_operand.vmem [shape: f32[8,128], index: 2, kind: input, shape index: {}]   ;;  %s1530_s3 = inlined_call_operand.vmem [shape: f32[4,128], index: 3, kind: input, shape index: {}]   ;;  %s1531_s4 = inlined_call_operand.vmem [shape: f32[1,128], index: 4, kind: input, shape index: {}]   ;;  %s1532_s5 = inlined_call_operand.hbm [shape: f32[128,128], index: 5, kind: input, shape index: {}]   ;;  %s1533_s6 = inlined_call_operand.vmem [shape: f32[1,128], index: 6, kind: input, shape index: {}]   ;;  %s1534_s7 = inlined_call_operand.hbm [shape: f32[128,128], index: 7, kind: input, shape index: {}]   ;;  %s1535_s8 = inlined_call_operand.vmem [shape: f32[1,128], index: 8, kind: input, shape index: {}]   ;;  %s1536_s9 = inlined_call_operand.vmem [shape: f32[8,128], index: 9, kind: input, shape index: {}]   ;;  %s1537_s10 = inlined_call_operand.hbm [shape: f32[16,128], index: 10, kind: output, shape index: {}]  }
   0x1   :  { %1539 = sst [smem:[#allocation11_spill]] %s1532_s5 }
   0x2   :  { %15 = vsyncpa [#allocation3], 0 }
   0x3   :  { %16 = vsyncpa [#allocation6], 0 }
   0x4   :  { %17 = vsyncpa [#allocation4], 0 }
   0x5   :  { %19 = vsyncpa [#allocation4 + $0x1], 0  ;;  %s1330_s13 = smov 0   ;;  %s1332_s14 = smov 0  }
   0x6   :  { %s1334_s15 = smov 0   ;;  %s1336_s16 = smov 0  }
   0x7 LB: > { %s1351_s17 = sadd.s32 4294967295, %s1265_s16   ;;  %s925_s18 = sadd.s32 4294967294, %s1265_s16   ;;  %s1265_s16 = sphi %s1336_s16, %s1553_s16   ;;  %s1261_s15 = sphi %s1334_s15, %s1552_s15   ;;  %s1257_s14 = sphi %s1332_s14, %s1551_s14   ;;  %s1253_s13 = sphi %s1330_s13, %s1550_s13  }
   0x8   : > { %s1355_s19 = sadd.s32 1, %s1265_s16   ;;  %s252_s20 = sadd.s32 1, %s1261_s15 }
   0x9   : > { %s249_s21 = ssub.s32 %s1265_s16, %s1355_s19  ;;  %p262_p0 = scmp.ne.s32.totalorder %s1261_s15, %s1257_s14 }
   0xa   : > { %p250_p1 = scmp.eq.s32.totalorder %s249_s21, 0  ;;  %p263_p2 = scmp.eq.s32.totalorder %s1351_s17, 1 }
   0xb   : > { %p268_p3 = scmp.ne.s32.totalorder %s1257_s14, %s1253_s13  ;;  %p269_p4 = scmp.eq.s32.totalorder %s925_s18, 1 }
   0xc   : > { %s1366_s22 = scalar_select %p250_p1, %s1261_s15, %s252_s20  }
   0xd   : > { %p1368_p5 = por %p263_p2, %p262_p0  ;;  %p1372_p6 = por %p269_p4, %p268_p3 }
   0xe   : > { %p926_p7 = scmp.ge.s32.totalorder %s1265_s16, 1  ;;  %p276_p8 = scmp.lt.s32.totalorder %s1265_s16, 3 }
   0xf   : > { %s1541_s24 = scalar_select %p1372_p6, 1, 0 }
  0x10   : > { %p1538_p9 = scmp.eq.s32.totalorder %s1351_s17, 0  ;;  %p1379_p10 = pnand %p926_p7, %p276_p8 }
  0x11   : > { %s1267_s26 = smov [#allocation2]   ;;  %s1268_s29 = smov [#allocation5]  }
  0x12   : > { %s297_s27 = sshll.u32 %s1267_s26, 4  ;;  %p1074_p11 = pneg %p1379_p10  ;;  %s298_s27 = int_to_ptr.vmem [resolvable:$true] %s297_s27 }
  0x13   : > { %s313_s30 = sshll.u32 %s1268_s29, 4  ;;  %s1156_s11 = scalar_lea.vmem %s298_s27, 2048  ;;  %s314_s30 = int_to_ptr.vmem [resolvable:$true] %s313_s30 }
  0x14   : > { %p1387_p12 = pnand %p1538_p9, %p1074_p11  ;;  %p1157_p0 = scmp.ne.s32.totalorder %s298_s27, %s1156_s11 }
  0x15   : > { %p1164_p3 = scmp.lt.s32.totalorder %s298_s27, %s298_s27  ;;  %p1165_p4 = scmp.lt.s32.totalorder %s1156_s11, %s1156_s11 }
  0x16   : > { %p1147_p13 = pneg %p1387_p12 }
  0x17   : > { %p1166_p7 = por %p1165_p4, %p1164_p3 }
  0x18   : > { %p1159_p1 = pnand %p1157_p0, %p1147_p13 }
  0x1a   : > { %p1160_p2 = pneg %p1159_p1 }
  0x1c   : > { %p1167_p8 = pnand %p1166_p7, %p1160_p2 }
  0x1e   : > { %1170 = shalt.err (!%p1167_p8)
}
  0x1f   : > { %s1269_s12 = smov 128   ;;  %s1270_s18 = smov 8  }
  0x20   : > { %s1544_s5 = sld [smem:[#allocation11_spill]]  ;;  %s1182_s26 = scalar_lea.vmem %s314_s30, 2048 }
  0x21   : > { %p1183_p11 = scmp.ne.s32.totalorder %s314_s30, %s1182_s26  ;;  %p1190_p9 = scmp.lt.s32.totalorder %s314_s30, %s314_s30 }
  0x22   : > { %p1191_p6 = scmp.lt.s32.totalorder %s1182_s26, %s1182_s26 }
  0x23   : > { %p1185_p0 = pnand %p1183_p11, %p1147_p13 }
  0x24   : > { %p1192_p3 = por %p1191_p6, %p1190_p9 }
  0x25   : > { %p1186_p1 = pneg %p1185_p0 }
  0x26   : > { %1077 = dma.hbm_to_vmem [thread:$0]  (!%p1387_p12), %s1544_s5, 2048, %s298_s27, [#allocation3], %s1269_s12, %s1269_s12, %s1270_s18  }
  0x27   : > { %p1193_p2 = pnand %p1192_p3, %p1186_p1 }
  0x29   : > { %1196 = shalt.err (!%p1193_p2)
}
  0x2a   : > { %1080 = dma.hbm_to_vmem [thread:$0]  (!%p1387_p12), %s1534_s7, 2048, %s314_s30, [#allocation6], %s1269_s12, %s1269_s12, %s1270_s18  }
  0x2b   : > { %349 = sbr.rel (%p1379_p10) target bundleno = 823 (0x337), region = 60  ;;  %p1545_p4 = scmp.eq.s32.totalorder (!%p1379_p10), %s1351_s17, 0 }
  0x30   : > { %1240 = dma.done.wait (%p1545_p4), [#allocation3], 2048   ;;  %p1546_p13 = pmov %p1545_p4 }
  0x31   : > { %p1547_p7 = pmov %p1545_p4 }
  0x32   : > { %1242 = vsyncadd (%p1546_p13), [#allocation3], 4294965248 }
  0x33   : > { %1244 = dma.done.wait (%p1547_p7), [#allocation6], 2048   ;;  %p1548_p6 = pmov %p1545_p4 }
  0x34   : > { %p394_p9 = scmp.lt.s32.totalorder %s1351_s17, 1  ;;  %v1271_v0 = vmov 0.0   ;;  %vm1272_vm0 = vmmov 0   ;;  %vm411_vm1 = vcmask 1043456   ;;  %vm407_vm2 = vcmask 31744   ;;  %v404_v2 = vld [vmem:[%s1529_s2] sm:$0xff] }
  0x35   : > { %1246 = vsyncadd (%p1548_p6), [#allocation6], 4294965248  ;;  %984 = vmatprep.subr.mxu0 %v1271_v0  ;;  %989 = vmatprep.subr.mxu1 %v1271_v0  ;;  %vm485_vm3 = vcmask 64512   ;;  %v405_v1 = vld [vmem:[%s1530_s3] sm:$0xf]  ;;  %v588_v5 = vld [vmem:[#allocation2 + $0x78] sm:$0xff]  ;;  %v767_v60 = vlaneseq }
  0x36   : > { %986 = vmatprep.mubr.msk.f32.mxu0 %vm1272_vm0, %v1271_v0  ;;  %991 = vmatprep.mubr.msk.f32.mxu1 %vm1272_vm0, %v1271_v0  ;;  %s395_s25 = scalar_select %p394_p9, %s1351_s17, 1  ;;  %v587_v6 = vld [vmem:[#allocation2 + $0x70] sm:$0xff]  ;;  %v586_v7 = vld [vmem:[#allocation2 + $0x68] sm:$0xff]  ;;  %v585_v8 = vld [vmem:[#allocation2 + $0x60] sm:$0xff] }
  0x37   : > { %985 = vmatpush3.msk.msra.mxu0 %vm411_vm1, %v405_v1  ;;  %990 = vmatpush3.msra.mxu1 %v404_v2  ;;  %v584_v9 = vld [vmem:[#allocation2 + $0x58] sm:$0xff]  ;;  %v583_v10 = vld [vmem:[#allocation2 + $0x50] sm:$0xff]  ;;  %v582_v11 = vld [vmem:[#allocation2 + $0x48] sm:$0xff]  ;;  %v768_v61 = vshrl.u32 %v767_v60, 7  ;;  %s943_s29 = sshll.u32 %s1351_s17, 7  ;;  %s1274_s18 = smov [#allocation7]  }
  0x38   : > { %s934_s27 = sshll.u32 %s395_s25, 3  ;;  %994 = vmatprep.subr.mxu0 %v1271_v0  ;;  %1029 = vmatprep.subr.mxu1 %v1271_v0  ;;  %v581_v12 = vld [vmem:[#allocation2 + $0x40] sm:$0xff]  ;;  %v580_v13 = vld [vmem:[#allocation2 + $0x38] sm:$0xff]  ;;  %v579_v14 = vld [vmem:[#allocation2 + $0x30] sm:$0xff]  ;;  %s1492_s28 = scalar_lea.hbm %s1537_s10, %s943_s29 }
  0x39   : > { %s401_s12 = scalar_lea.vmem %s1528_s1, %s934_s27  ;;  %s397_s21 = scalar_lea.vmem %s1527_s0, %s934_s27  ;;  %v578_v15 = vld [vmem:[#allocation2 + $0x28] sm:$0xff]  ;;  %v577_v16 = vld [vmem:[#allocation2 + $0x20] sm:$0xff]  ;;  %v576_v17 = vld [vmem:[#allocation2 + $0x18] sm:$0xff]  ;;  %v769_v62 = vsub.s32 0, %v768_v61 }
  0x3a   : > { %v403_v3 = vld [vmem:[%s401_s12] sm:$0xff]  ;;  %v575_v18 = vld [vmem:[#allocation2 + $0x10] sm:$0xff]  ;;  %v574_v19 = vld [vmem:[#allocation2 + $0x8] sm:$0xff]  ;;  %s1201_s17 = sshll.u32 %s1274_s18, 4  ;;  %s1202_s17 = int_to_ptr.vmem [resolvable:$false] %s1201_s17 }
  0x3b   : > { %v402_v4 = vld [vmem:[%s397_s21] sm:$0xff]  ;;  %987 = vmatmul.mubr.msk.f32.vlgmr.msra.gmra.mxu0 %vm407_vm2, %v403_v3  ;;  %v688_v34 = vld [vmem:[#allocation5 + $0x78] sm:$0xff]  ;;  %v687_v35 = vld [vmem:[#allocation5 + $0x70] sm:$0xff]  ;;  %s391_s21 = sand.u32 1, %s1257_s14   ;;  %s1203_s20 = scalar_lea.vmem %s1202_s17, 256 }
  0x3c   : > { %992 = vmatmul.mubr.msk.f32.vlgmr.msra.gmra.mxu1 %vm485_vm3, %v402_v4  ;;  %1026 = vmatprep.mubr.msk.f32.mxu0 %vm1272_vm0, %v1271_v0  ;;  %v573_v20 = vld [vmem:[#allocation2] sm:$0xff]  ;;  %v686_v36 = vld [vmem:[#allocation5 + $0x68] sm:$0xff]  ;;  %v684_v38 = vld [vmem:[#allocation5 + $0x58] sm:$0xff]  ;;  %s933_s26 = sshll.u32 %s391_s21, 3  ;;  %s819_s30 = scalar_lea.sflag [#allocation4], %s391_s21 }
  0x3d   : > { %1061 = vmatprep.mubr.msk.f32.mxu1 %vm1272_vm0, %v1271_v0  ;;  %995 = vmatpush3.msra.mxu0 %v588_v5  ;;  %v939_v22 = vld [vmem:[%s1531_s4] ss:$0 sm:$0xff]  ;;  %v683_v39 = vld [vmem:[#allocation5 + $0x50] sm:$0xff]  ;;  %v682_v40 = vld [vmem:[#allocation5 + $0x48] sm:$0xff]  ;;  %s393_s11 = scalar_lea.vmem [#allocation7], %s933_s26 }
  0x3e   : > { %996 = vmatprep.subr.mxu0 %v1271_v0  ;;  %1030 = vmatpush3.msra.mxu1 %v688_v34  ;;  %v685_v37 = vld [vmem:[#allocation5 + $0x60] sm:$0xff]  ;;  %v680_v42 = vld [vmem:[#allocation5 + $0x38] sm:$0xff]  ;;  %v679_v43 = vld [vmem:[#allocation5 + $0x30] sm:$0xff]  ;;  %s832_s5 = sshll.u32 %s393_s11, 4  ;;  %s833_s5 = int_to_ptr.vmem [resolvable:$true] %s832_s5 }
  0x3f   : > { %997 = vmatpush3.msra.mxu0 %v587_v6  ;;  %1031 = vmatprep.subr.mxu1 %v1271_v0  ;;  %v681_v41 = vld [vmem:[#allocation5 + $0x40] sm:$0xff]  ;;  %v678_v44 = vld [vmem:[#allocation5 + $0x28] sm:$0xff]  ;;  %v676_v46 = vld [vmem:[#allocation5 + $0x18] sm:$0xff]  ;;  %s1197_s12 = scalar_lea.vmem %s833_s5, 128  ;;  %p1204_p11 = scmp.lt.s32.totalorder %s833_s5, %s1202_s17 }
  0x40   : > { %998 = vmatprep.subr.mxu0 %v1271_v0  ;;  %1032 = vmatpush3.msra.mxu1 %v687_v35  ;;  %v677_v45 = vld [vmem:[#allocation5 + $0x20] sm:$0xff]  ;;  %v675_v47 = vld [vmem:[#allocation5 + $0x10] sm:$0xff]  ;;  %v674_v48 = vld [vmem:[#allocation5 + $0x8] sm:$0xff]  ;;  %p1198_p10 = scmp.ne.s32.totalorder %s833_s5, %s1197_s12  ;;  %p1205_p0 = scmp.lt.s32.totalorder %s1203_s20, %s1197_s12 }
  0x41   : > { %999 = vmatpush3.msra.mxu0 %v586_v7  ;;  %1033 = vmatprep.subr.mxu1 %v1271_v0  ;;  %v673_v49 = vld [vmem:[#allocation5] sm:$0xff] }
  0x42   : > { %1000 = vmatprep.subr.mxu0 %v1271_v0  ;;  %1034 = vmatpush3.msra.mxu1 %v686_v36  ;;  %v940_v50 = vld [vmem:[%s1533_s6] ss:$0 sm:$0xff]  ;;  %p1199_p12 = pnand %p1198_p10, %p1368_p5  ;;  %p1206_p1 = por %p1205_p0, %p1204_p11 }
  0x43   : > { %1001 = vmatpush3.msra.mxu0 %v585_v8  ;;  %1035 = vmatprep.subr.mxu1 %v1271_v0  ;;  %v766_v63 = vld [vmem:[%s1536_s9] sm:$0xff] }
  0x44   : > { %1002 = vmatprep.subr.mxu0 %v1271_v0  ;;  %1036 = vmatpush3.msra.mxu1 %v685_v37  ;;  %v770_v1 = vrot.slane %v766_v63, %v769_v62  ;;  %vm809_vm5 = vcmp.gt.f32.partialorder %v766_v63, 0.5  ;;  %p1200_p8 = pneg %p1199_p12 }
  0x45   : > { %1003 = vmatpush3.msra.mxu0 %v584_v9  ;;  %1037 = vmatprep.subr.mxu1 %v1271_v0 }
  0x46   : > { %1004 = vmatprep.subr.mxu0 %v1271_v0  ;;  %1038 = vmatpush3.msra.mxu1 %v684_v38  ;;  %p1207_p3 = pnand %p1206_p1, %p1200_p8 }
  0x47   : > { %1005 = vmatpush3.msra.mxu0 %v583_v10  ;;  %1039 = vmatprep.subr.mxu1 %v1271_v0 }
  0x48   : > { %1006 = vmatprep.subr.mxu0 %v1271_v0  ;;  %1040 = vmatpush3.msra.mxu1 %v683_v39 }
  0x49   : > { %1007 = vmatpush3.msra.mxu0 %v582_v11  ;;  %1041 = vmatprep.subr.mxu1 %v1271_v0 }
  0x4a   : > { %1008 = vmatprep.subr.mxu0 %v1271_v0  ;;  %1042 = vmatpush3.msra.mxu1 %v682_v40 }
  0x4b   : > { %1009 = vmatpush3.msra.mxu0 %v581_v12  ;;  %1043 = vmatprep.subr.mxu1 %v1271_v0 }
  0x4c   : > { %1010 = vmatprep.subr.mxu0 %v1271_v0  ;;  %1044 = vmatpush3.msra.mxu1 %v681_v41 }
  0x4d   : > { %1011 = vmatpush3.msra.mxu0 %v580_v13  ;;  %1045 = vmatprep.subr.mxu1 %v1271_v0 }
  0x4e   : > { %1012 = vmatprep.subr.mxu0 %v1271_v0  ;;  %1046 = vmatpush3.msra.mxu1 %v680_v42 }
  0x4f   : > { %1013 = vmatpush3.msra.mxu0 %v579_v14  ;;  %1047 = vmatprep.subr.mxu1 %v1271_v0 }
  0x50   : > { %1014 = vmatprep.subr.mxu0 %v1271_v0  ;;  %1048 = vmatpush3.msra.mxu1 %v679_v43 }
  0x51   : > { %1015 = vmatpush3.msra.mxu0 %v578_v15  ;;  %1049 = vmatprep.subr.mxu1 %v1271_v0  ;;  %v790_v15 = vsub.s32 1, %v768_v61 }
  0x52   : > { %1016 = vmatprep.subr.mxu0 %v1271_v0  ;;  %1050 = vmatpush3.msra.mxu1 %v678_v44 }
  0x53   : > { %1017 = vmatpush3.msra.mxu0 %v577_v16  ;;  %1051 = vmatprep.subr.mxu1 %v1271_v0 }
  0x54   : > { %1018 = vmatprep.subr.mxu0 %v1271_v0  ;;  %1052 = vmatpush3.msra.mxu1 %v677_v45 }
  0x55   : > { %1019 = vmatpush3.msra.mxu0 %v576_v17  ;;  %1053 = vmatprep.subr.mxu1 %v1271_v0 }
  0x56   : > { %1020 = vmatprep.subr.mxu0 %v1271_v0  ;;  %1054 = vmatpush3.msra.mxu1 %v676_v46 }
  0x57   : > { %1021 = vmatpush3.msra.mxu0 %v575_v18  ;;  %1055 = vmatprep.subr.mxu1 %v1271_v0 }
  0x58   : > { %1022 = vmatprep.subr.mxu0 %v1271_v0  ;;  %1056 = vmatpush3.msra.mxu1 %v675_v47 }
  0x59   : > { %1023 = vmatpush3.msra.mxu0 %v574_v19  ;;  %1057 = vmatprep.subr.mxu1 %v1271_v0 }
  0x5a   : > { %1024 = vmatprep.subr.mxu0 %v1271_v0  ;;  %1058 = vmatpush3.msra.mxu1 %v674_v48 }
  0x5b   : > { %1025 = vmatpush3.msra.mxu0 %v573_v20  ;;  %1059 = vmatprep.subr.mxu1 %v1271_v0  ;;  %v941_v0 = vld [vmem:[%s1535_s8] ss:$0 sm:$0xff] }
  0x5c   : > { %1060 = vmatpush3.msra.mxu1 %v673_v49 }
  0xfb   : > { %v481_v21 = vpop.f32.mrf.mxu0 }
  0xfc   : > { %v555_v23 = vpop.f32.mrf.mxu1 }
  0xfd   : > { %v556_v24 = vadd.f32 %v555_v23, %v481_v21  ;;  %v988_v25 = vpop.f32.mrf.mxu0  ;;  %v791_v21 = vrot.slane %v766_v63, %v790_v15 }
  0xfe   : > { %v993_v26 = vpop.f32.mrf.mxu1 }
  0xff   : > { %v565_v27 = vadd.f32 %v939_v22, %v556_v24 }
 0x101   : > { %v566_v28 = vsub.f32 0.0, %v565_v27 }
 0x103   : > { %v567_v29 = vmul.f32 1.442695, %v566_v28 }
 0x105   : > { %1129 = vpow2.f32 %v567_v29 }
 0x112   : > { %v1130_v30 = vpop.eup %1129 }
 0x113   : > { %v569_v31 = vadd.f32 1.0, %v1130_v30 }
 0x115   : > { %1131 = vrcp.f32 %v569_v31  ;;  %v813_v31 = vsub.s32 2, %v768_v61 }
 0x122   : > { %v1132_v32 = vpop.eup %1131 }
 0x123   : > { %v572_v33 = vmul.f32 %v1132_v32, %v565_v27 }
 0x125   : > { %1027 = vmatmul.mubr.f32.vlgmr.msra.gmra.mxu0 %v572_v33  ;;  %v1273_v33 = vmov 0  }
 0x126   : > { %v810_v34 = vsel %vm809_vm5, 1, %v1273_v33 }
 0x127   : > { %v814_v38 = vrot.slane %v810_v34, %v813_v31 }
 0x129   : > { %vm815_vm7 = vcmp.eq.s32.totalorder %v814_v38, 1 }
 0x1e5   : > { %v662_v51 = vpop.f32.mrf.mxu0 }
 0x1e6   : > { %v663_v52 = vadd.f32 %v940_v50, %v662_v51 }
 0x1e7   : > { %v1028_v53 = vpop.f32.mrf.mxu0 }
 0x1e8   : > { %v666_v54 = vsub.f32 0.0, %v663_v52 }
 0x1ea   : > { %v667_v55 = vmul.f32 1.442695, %v666_v54 }
 0x1ec   : > { %1133 = vpow2.f32 %v667_v55 }
 0x1f9   : > { %v1134_v56 = vpop.eup %1133 }
 0x1fa   : > { %v669_v57 = vadd.f32 1.0, %v1134_v56 }
 0x1fc   : > { %1135 = vrcp.f32 %v669_v57 }
 0x209   : > { %v1136_v58 = vpop.eup %1135 }
 0x20a   : > { %v672_v59 = vmul.f32 %v1136_v58, %v663_v52 }
 0x20c   : > { %1062 = vmatmul.mubr.f32.vlgmr.msra.gmra.mxu1 %v672_v59 }
 0x2cc   : > { %v762_v2 = vpop.f32.mrf.mxu1 }
 0x2cd   : > { %v763_v3 = vadd.f32 %v941_v0, %v762_v2 }
 0x2ce   : > { %v1063_v4 = vpop.f32.mrf.mxu1 }
 0x2cf   : > { %v771_v5 = vsub.f32 %v770_v1, %v763_v3 }
 0x2d1   : > { %v773_v6 = vand.u32 2147483647, %v771_v5  ;;  %v772_v18 = vmax.f32 %v771_v5, 0.0 }
 0x2d3   : > { %v774_v7 = vsub.f32 0.0, %v773_v6 }
 0x2d5   : > { %v775_v8 = vmul.f32 1.442695, %v774_v7 }
 0x2d7   : > { %1137 = vpow2.f32 %v775_v8 }
 0x2e4   : > { %v1138_v9 = vpop.eup %1137 }
 0x2e5   : > { %v777_v10 = vadd.f32 1.0, %v1138_v9  ;;  %v780_v11 = vmul.f32 -0.5, %v1138_v9  ;;  %v783_v13 = vand.u32 2147483647, %v1138_v9 }
 0x2e7   : > { %1139 = vlog2.f32 %v777_v10  ;;  %v781_v12 = vadd.f32 1.0, %v780_v11  ;;  %vm784_vm4 = vcmp.lt.f32.partialorder %v783_v13, 0.0004427343 }
 0x2e9   : > { %v782_v17 = vmul.f32 %v1138_v9, %v781_v12 }
 0x2f4   : > { %v1140_v14 = vpop.eup %1139 }
 0x2f5   : > { %v779_v16 = vmul.f32 0.6931472, %v1140_v14 }
 0x2f7   : > { %v785_v19 = vsel %vm784_vm4, %v782_v17, %v779_v16 }
 0x2f8   : > { %v786_v20 = vadd.f32 %v785_v19, %v772_v18 }
 0x2fa   : > { %v787_v22 = vsub.f32 %v770_v1, %v786_v20 }
 0x2fc   : > { %v792_v23 = vsub.f32 %v787_v22, %v791_v21 }
 0x2fe   : > { %v794_v24 = vand.u32 2147483647, %v792_v23  ;;  %v793_v39 = vmax.f32 %v792_v23, 0.0 }
 0x300   : > { %v795_v25 = vsub.f32 0.0, %v794_v24 }
 0x302   : > { %v796_v26 = vmul.f32 1.442695, %v795_v25 }
 0x304   : > { %1141 = vpow2.f32 %v796_v26 }
 0x311   : > { %v1142_v27 = vpop.eup %1141 }
 0x312   : > { %v798_v28 = vadd.f32 1.0, %v1142_v27  ;;  %v801_v29 = vmul.f32 -0.5, %v1142_v27  ;;  %v804_v32 = vand.u32 2147483647, %v1142_v27 }
 0x314   : > { %1143 = vlog2.f32 %v798_v28  ;;  %v802_v30 = vadd.f32 1.0, %v801_v29  ;;  %vm805_vm6 = vcmp.lt.f32.partialorder %v804_v32, 0.0004427343 }
 0x316   : > { %v803_v37 = vmul.f32 %v1142_v27, %v802_v30 }
 0x321   : > { %v1144_v35 = vpop.eup %1143 }
 0x322   : > { %v800_v36 = vmul.f32 0.6931472, %v1144_v35 }
 0x324   : > { %v806_v40 = vsel %vm805_vm6, %v803_v37, %v800_v36 }
 0x325   : > { %v807_v41 = vadd.f32 %v806_v40, %v793_v39 }
 0x327   : > { %v808_v42 = vadd.f32 %v807_v41, %v791_v21 }
 0x329   : > { %v816_v43 = vsel %vm815_vm7, %v808_v42, %v763_v3 }
 0x32a   : > { %817 = vst [vmem:[%s393_s11] sm:$0xff] %v816_v43 }
 0x32b   : > { %1210 = shalt.err (!%p1207_p3)
}
 0x32c   : > { %s1211_s26 = scalar_lea.hbm %s1492_s28, 128  ;;  %s1215_s11 = scalar_lea.hbm %s1537_s10, 256 }
 0x32d   : > { %p1212_p2 = scmp.ne.s32.totalorder %s1492_s28, %s1211_s26  ;;  %p1216_p7 = scmp.lt.s32.totalorder %s1492_s28, %s1537_s10 }
 0x32e   : > { %p1217_p6 = scmp.lt.s32.totalorder %s1215_s11, %s1211_s26 }
 0x32f   : > { %p1213_p4 = pnand %p1212_p2, %p1368_p5 }
 0x330   : > { %p1218_p9 = por %p1217_p6, %p1216_p7 }
 0x331   : > { %p1214_p13 = pneg %p1213_p4 }
 0x333   : > { %p1219_p10 = pnand %p1218_p9, %p1214_p13 }
 0x335   : > { %1222 = shalt.err (!%p1219_p10)
}
 0x336   : > { %1072 = dma.vmem_to_hbm [thread:$0]  (%p1368_p5), %s833_s5, 128, %s1492_s28, %s819_s30  }
 0x337 PF: > { %p1089_p12 = scmp.ge.s32.totalorder %s1265_s16, 2  ;;  %s844_s12 = sand.u32 1, %s1253_s13  }
 0x338   : > { %p1549_p8 = scmp.ne.s32.totalorder %s1541_s24, 0  ;;  %s845_s18 = scalar_lea.sflag [#allocation4], %s844_s12 }
 0x33a   : > { %p1082_p11 = pnand %p1089_p12, %p1549_p8 }
 0x33c   : > { %p1083_p0 = pneg %p1082_p11 }
 0x33e   : > { %1248 = dma.done.wait (%p1083_p0), %s845_s18, 128  }
 0x33f   : > { %1250 = vsyncadd (%p1083_p0), %s845_s18, 4294967168  ;;  %p22_p1 = scmp.ge.s32.totalorder %s1355_s19, 4   ;;  %s1550_s13 = smov %s1257_s14 }
 0x340   : > { %s1551_s14 = smov %s1261_s15  ;;  %s1552_s15 = smov %s1366_s22 }
 0x341   : > { %s1553_s16 = smov %s1355_s19  ;;  %24 = sbr.rel (!%p22_p1) target bundleno = 7 (0x7), region = 107 }
 0x346   :  { %850 = vsyncpa [#allocation3], 1 }
 0x347   :  { %852 = vsyncpa [#allocation3 + $0x1], 1 }
 0x348   :  { %853 = vsyncpa [#allocation6], 1 }
 0x349   :  { %854 = vsyncpa [#allocation4], 1 }
 0x34a   :  { %856 = vsyncpa [#allocation4 + $0x1], 1 }

</bundles_post_ra>
